<compile_context>
chip_gen: v6e
topology: v6e:2x2x1
jax: 0.10.0
libtpu: 0.0.40
codegen_flags: <defaults>
</compile_context>

<pallas_src>
import jax
import jax.numpy as jnp
from jax.experimental import pallas as pl
from jax.experimental.pallas import tpu as pltpu


def gtconv_kernel(a_ref, w_ref, o_ref):
    # a_ref, w_ref : (C, TM, TN)   o_ref : (TM, TN)
    C = w_ref.shape[0]

    # pass 1: running channel-max -- one (TM, TN) f32 slab live at a time.
    m = w_ref[0].astype(jnp.float32)
    for c in range(1, C):
        m = jnp.maximum(m, w_ref[c].astype(jnp.float32))

    # pass 2: accumulate numerator / denominator one channel slab at a time:
    #   out = sum_c(a_c * e_c) / sum_c(e_c),  e_c = exp(w_c - m)
    # (re-reading w from VMEM is nearly free: 3 vld slots per cycle).
    e = jnp.exp(w_ref[0].astype(jnp.float32) - m)
    num = a_ref[0].astype(jnp.float32) * e
    den = e
    for c in range(1, C):
        e = jnp.exp(w_ref[c].astype(jnp.float32) - m)
        num = num + a_ref[c].astype(jnp.float32) * e
        den = den + e

    # exact reciprocal keeps the 1e-5 tolerance (approx=True -> ~1e-3 rel err,
    # and the EUP has slack anyway -- the DMA slot saturates first).
    o_ref[...] = (num * pl.reciprocal(den, approx=False)).astype(o_ref.dtype)


def _round_up(x, m):
    return ((x + m - 1) // m) * m


def gtconv_forward(A, weight, *, target_block_bytes=None, vmem_limit_bytes=None):
    """A: (C, U, I, D); weight: (1, C, U, I, D) -> (U, I, D)."""
    O, C, U, I, D = weight.shape
    assert O == 1, "squeeze(dim=0) in the reference requires out_channels == 1"
    assert A.shape == (C, U, I, D)

    N = I * D
    itemsize = jnp.dtype(A.dtype).itemsize

    # ---- generation-gated block budget ------------------------------------
    if target_block_bytes is None:
        target_block_bytes = 2 << 20           # safe on every generation
        try:
            info = pltpu.get_tpu_info()
            vmem_cap = int(getattr(info, "vmem_capacity_bytes", 0) or 0)
        except Exception:
            vmem_cap = 0
        if vmem_cap >= (100 << 20):
            # v5e / v6e: 128 MiB physical VMEM -> bigger blocks, fewer grid
            # steps (amortizes ~0.35 us per-step pipeline overhead). Needs an
            # explicit scoped-VMEM raise (v5e default is only 16 MiB).
            target_block_bytes = 4 << 20
            if vmem_limit_bytes is None:
                vmem_limit_bytes = 48 << 20
        # v7x (64 MiB physical / 32 MiB default scoped) or unknown: keep the
        # 2 MiB blocks; double-buffered footprint ~10 MiB fits the default.

    # ---- tile selection ----------------------------------------------------
    # Prefer a full-N lane tile: one long contiguous DMA per (c, row-range)
    # and guaranteed unmasked, lane-dense output stores. Only tile N when a
    # min-height (tm = 8) full-N block does not fit the block budget.
    N_pad = _round_up(N, 128)
    if C * 8 * N_pad * itemsize <= target_block_bytes:
        tn = N_pad
    else:
        cap = max(128, (target_block_bytes // (C * 8 * itemsize)) // 128 * 128)
        tn = min(N_pad, cap)
        N_pad = _round_up(N, tn)

    # sublane tile: as many 8-row groups as fit the per-input-block budget.
    rows = max(8, (target_block_bytes // (C * tn * itemsize)) // 8 * 8)
    tm = min(rows, _round_up(U, 8))

    # v7x megacore: make sure both TensorCores get work (>= 2 programs on a
    # "parallel" axis) whenever the problem is big enough to split.
    if pl.cdiv(U, tm) * pl.cdiv(N_pad, tn) < 2:
        if U > 8:
            tm = max(8, _round_up(pl.cdiv(U, 2), 8))
        elif N_pad > 128:
            tn = max(128, (pl.cdiv(N_pad, 2) // 128) * 128)
            N_pad = _round_up(N, tn)

    U_pad = _round_up(U, tm)
    grid = (U_pad // tm, N_pad // tn)

    # ---- pad inputs to aligned extents (sliced off after the call) --------
    a2 = A.reshape(C, U, N)
    w2 = weight.reshape(C, U, N)
    if U_pad != U or N_pad != N:
        pad = ((0, 0), (0, U_pad - U), (0, N_pad - N))
        a2 = jnp.pad(a2, pad)
        w2 = jnp.pad(w2, pad)

    # advisory cost hint so XLA schedules neighbors around the custom call
    elems = C * U_pad * N_pad
    cost = pl.CostEstimate(
        flops=5 * elems,                      # max/sub/mul/add (elementwise)
        transcendentals=elems,                # one exp per (c, u, n)
        bytes_accessed=(a2.size + w2.size + U_pad * N_pad) * itemsize,
    )

    cp_kwargs = dict(dimension_semantics=("parallel", "parallel"))
    if vmem_limit_bytes is not None:
        cp_kwargs["vmem_limit_bytes"] = vmem_limit_bytes

    out = pl.pallas_call(
        gtconv_kernel,
        out_shape=jax.ShapeDtypeStruct((U_pad, N_pad), A.dtype),
        grid_spec=pltpu.PrefetchScalarGridSpec(
            num_scalar_prefetch=0,
            grid=grid,
            in_specs=[
                pl.BlockSpec((C, tm, tn), lambda i, j: (0, i, j)),
                pl.BlockSpec((C, tm, tn), lambda i, j: (0, i, j)),
            ],
            out_specs=pl.BlockSpec((tm, tn), lambda i, j: (i, j)),
        ),
        compiler_params=pltpu.CompilerParams(**cp_kwargs),
        cost_estimate=cost,
    )(a2, w2)

    return out[:U, :N].reshape(U, I, D)


def gtconv_reference(A, weight):
    # pure-JAX reference mirroring the PyTorch forward
    p = jax.nn.softmax(weight, axis=1)                    # softmax over in_channels
    prod = A[None] * p                                    # (1, C, U, I, D)
    return jnp.sum(jnp.squeeze(prod, axis=0), axis=0)     # (U, I, D)


if __name__ == "__main__":
    # Module hyper-params (small, consistent with GTConv.__init__)
    in_channels, out_channels = 4, 1
    num_user, num_item, num_dim = 16, 16, 8

    key = jax.random.PRNGKey(0)
    k_a, k_w = jax.random.split(key)

    A = jax.random.normal(
        k_a, (in_channels, num_user, num_item, num_dim), dtype=jnp.float32)

    # reset_parameters(): constant 0.1 init, bias=None; scale=0.1 unused in fwd
    weight_const = jnp.full(
        (out_channels, in_channels, num_user, num_item, num_dim),
        0.1, dtype=jnp.float32)

    out = jax.block_until_ready(gtconv_forward(A, weight_const))
    ref = gtconv_reference(A, weight_const)
    assert out.shape == (num_user, num_item, num_dim)
    assert jnp.allclose(out, ref, atol=1e-5, rtol=1e-5)

    # also exercise a non-uniform softmax path
    weight_rand = 0.5 * jax.random.normal(
        k_w, (out_channels, in_channels, num_user, num_item, num_dim),
        dtype=jnp.float32)
    out2 = jax.block_until_ready(gtconv_forward(A, weight_rand))
    ref2 = gtconv_reference(A, weight_rand)
    assert jnp.allclose(out2, ref2, atol=1e-5, rtol=1e-5)

    # non-aligned / odd shapes go through the padding path
    U3, I3, D3 = 10, 7, 5
    A3 = jax.random.normal(k_a, (in_channels, U3, I3, D3), dtype=jnp.float32)
    W3 = 0.5 * jax.random.normal(
        k_w, (out_channels, in_channels, U3, I3, D3), dtype=jnp.float32)
    out3 = jax.block_until_ready(gtconv_forward(A3, W3))
    ref3 = gtconv_reference(A3, W3)
    assert out3.shape == (U3, I3, D3)
    assert jnp.allclose(out3, ref3, atol=1e-5, rtol=1e-5)

    print("KERNEL_OK")
</pallas_src>

<mosaic_0001>
module attributes {stable_mosaic.version = 11 : i64} {
  func.func @gtconv_kernel(%arg0: i32, %arg1: i32, %arg2: memref<4x8x128xf32, #tpu.memory_space<vmem>>, %arg3: memref<4x8x128xf32, #tpu.memory_space<vmem>>, %arg4: memref<8x128xf32, #tpu.memory_space<vmem>>) attributes {dimension_semantics = [#tpu.dimension_semantics<parallel>, #tpu.dimension_semantics<parallel>], iteration_bounds = array<i64: 2, 1>, scalar_prefetch = 0 : i64, scratch_operands = 0 : i64, tpu.core_type = #tpu.core_type<tc>, window_params = [{transform_indices = @transform_0, window_bounds = array<i64: 4, 8, 128>}, {transform_indices = @transform_1, window_bounds = array<i64: 4, 8, 128>}, {transform_indices = @transform_2, window_bounds = array<i64: 8, 128>}]} {
    %c0 = arith.constant 0 : index
    %c0_0 = arith.constant 0 : index
    %c0_1 = arith.constant 0 : index
    %0 = vector.load %arg3[%c0, %c0_0, %c0_1] : memref<4x8x128xf32, #tpu.memory_space<vmem>>, vector<1x8x128xf32>
    %1 = vector.shape_cast %0 : vector<1x8x128xf32> to vector<8x128xf32>
    %c1 = arith.constant 1 : index
    %c0_2 = arith.constant 0 : index
    %c0_3 = arith.constant 0 : index
    %2 = vector.load %arg3[%c1, %c0_2, %c0_3] : memref<4x8x128xf32, #tpu.memory_space<vmem>>, vector<1x8x128xf32>
    %3 = vector.shape_cast %2 : vector<1x8x128xf32> to vector<8x128xf32>
    %4 = arith.maximumf %1, %3 : vector<8x128xf32>
    %c2 = arith.constant 2 : index
    %c0_4 = arith.constant 0 : index
    %c0_5 = arith.constant 0 : index
    %5 = vector.load %arg3[%c2, %c0_4, %c0_5] : memref<4x8x128xf32, #tpu.memory_space<vmem>>, vector<1x8x128xf32>
    %6 = vector.shape_cast %5 : vector<1x8x128xf32> to vector<8x128xf32>
    %7 = arith.maximumf %4, %6 : vector<8x128xf32>
    %c3 = arith.constant 3 : index
    %c0_6 = arith.constant 0 : index
    %c0_7 = arith.constant 0 : index
    %8 = vector.load %arg3[%c3, %c0_6, %c0_7] : memref<4x8x128xf32, #tpu.memory_space<vmem>>, vector<1x8x128xf32>
    %9 = vector.shape_cast %8 : vector<1x8x128xf32> to vector<8x128xf32>
    %10 = arith.maximumf %7, %9 : vector<8x128xf32>
    %c0_8 = arith.constant 0 : index
    %c0_9 = arith.constant 0 : index
    %c0_10 = arith.constant 0 : index
    %11 = vector.load %arg3[%c0_8, %c0_9, %c0_10] : memref<4x8x128xf32, #tpu.memory_space<vmem>>, vector<1x8x128xf32>
    %12 = vector.shape_cast %11 : vector<1x8x128xf32> to vector<8x128xf32>
    %13 = arith.subf %12, %10 : vector<8x128xf32>
    %14 = math.exp %13 : vector<8x128xf32>
    %c0_11 = arith.constant 0 : index
    %c0_12 = arith.constant 0 : index
    %c0_13 = arith.constant 0 : index
    %15 = vector.load %arg2[%c0_11, %c0_12, %c0_13] : memref<4x8x128xf32, #tpu.memory_space<vmem>>, vector<1x8x128xf32>
    %16 = vector.shape_cast %15 : vector<1x8x128xf32> to vector<8x128xf32>
    %17 = arith.mulf %16, %14 : vector<8x128xf32>
    %c1_14 = arith.constant 1 : index
    %c0_15 = arith.constant 0 : index
    %c0_16 = arith.constant 0 : index
    %18 = vector.load %arg3[%c1_14, %c0_15, %c0_16] : memref<4x8x128xf32, #tpu.memory_space<vmem>>, vector<1x8x128xf32>
    %19 = vector.shape_cast %18 : vector<1x8x128xf32> to vector<8x128xf32>
    %20 = arith.subf %19, %10 : vector<8x128xf32>
    %21 = math.exp %20 : vector<8x128xf32>
    %c1_17 = arith.constant 1 : index
    %c0_18 = arith.constant 0 : index
    %c0_19 = arith.constant 0 : index
    %22 = vector.load %arg2[%c1_17, %c0_18, %c0_19] : memref<4x8x128xf32, #tpu.memory_space<vmem>>, vector<1x8x128xf32>
    %23 = vector.shape_cast %22 : vector<1x8x128xf32> to vector<8x128xf32>
    %24 = arith.mulf %23, %21 : vector<8x128xf32>
    %25 = arith.addf %17, %24 : vector<8x128xf32>
    %26 = arith.addf %14, %21 : vector<8x128xf32>
    %c2_20 = arith.constant 2 : index
    %c0_21 = arith.constant 0 : index
    %c0_22 = arith.constant 0 : index
    %27 = vector.load %arg3[%c2_20, %c0_21, %c0_22] : memref<4x8x128xf32, #tpu.memory_space<vmem>>, vector<1x8x128xf32>
    %28 = vector.shape_cast %27 : vector<1x8x128xf32> to vector<8x128xf32>
    %29 = arith.subf %28, %10 : vector<8x128xf32>
    %30 = math.exp %29 : vector<8x128xf32>
    %c2_23 = arith.constant 2 : index
    %c0_24 = arith.constant 0 : index
    %c0_25 = arith.constant 0 : index
    %31 = vector.load %arg2[%c2_23, %c0_24, %c0_25] : memref<4x8x128xf32, #tpu.memory_space<vmem>>, vector<1x8x128xf32>
    %32 = vector.shape_cast %31 : vector<1x8x128xf32> to vector<8x128xf32>
    %33 = arith.mulf %32, %30 : vector<8x128xf32>
    %34 = arith.addf %25, %33 : vector<8x128xf32>
    %35 = arith.addf %26, %30 : vector<8x128xf32>
    %c3_26 = arith.constant 3 : index
    %c0_27 = arith.constant 0 : index
    %c0_28 = arith.constant 0 : index
    %36 = vector.load %arg3[%c3_26, %c0_27, %c0_28] : memref<4x8x128xf32, #tpu.memory_space<vmem>>, vector<1x8x128xf32>
    %37 = vector.shape_cast %36 : vector<1x8x128xf32> to vector<8x128xf32>
    %38 = arith.subf %37, %10 : vector<8x128xf32>
    %39 = math.exp %38 : vector<8x128xf32>
    %c3_29 = arith.constant 3 : index
    %c0_30 = arith.constant 0 : index
    %c0_31 = arith.constant 0 : index
    %40 = vector.load %arg2[%c3_29, %c0_30, %c0_31] : memref<4x8x128xf32, #tpu.memory_space<vmem>>, vector<1x8x128xf32>
    %41 = vector.shape_cast %40 : vector<1x8x128xf32> to vector<8x128xf32>
    %42 = arith.mulf %41, %39 : vector<8x128xf32>
    %43 = arith.addf %34, %42 : vector<8x128xf32>
    %44 = arith.addf %35, %39 : vector<8x128xf32>
    %45 = tpu.reciprocal %44 : vector<8x128xf32> -> vector<8x128xf32>
    %46 = arith.mulf %43, %45 : vector<8x128xf32>
    %c0_32 = arith.constant 0 : index
    %c0_33 = arith.constant 0 : index
    %47 = vector.load %arg4[%c0_32, %c0_33] : memref<8x128xf32, #tpu.memory_space<vmem>>, vector<8x128xf32>
    tpu.vector_store %arg4[%c0_32, %c0_33], %46 {strides = array<i32>} : memref<8x128xf32, #tpu.memory_space<vmem>>, vector<8x128xf32>,
    return
  }
  func.func @transform_0(%arg0: i32, %arg1: i32) -> (i32, i32, i32) {
    %c0_i32 = arith.constant 0 : i32
    %c0_i32_0 = arith.constant 0 : i32
    return %c0_i32, %arg0, %arg1 : i32, i32, i32
  }
  func.func @transform_1(%arg0: i32, %arg1: i32) -> (i32, i32, i32) {
    %c0_i32 = arith.constant 0 : i32
    %c0_i32_0 = arith.constant 0 : i32
    return %c0_i32, %arg0, %arg1 : i32, i32, i32
  }
  func.func @transform_2(%arg0: i32, %arg1: i32) -> (i32, i32) {
    %c0_i32 = arith.constant 0 : i32
    return %arg0, %arg1 : i32, i32
  }
}

</mosaic_0001>

<bundles_post_ra>
// kernel: tpu_custom_call.1
= control target key start
LH: loop header
LB: loop body
LE: loop exit
PB: predicated region body
PF: predicated region fallthrough
CT: control target
= control target key end

     0   :  { %s820_s0 = inlined_call_operand.hbm [shape: f32[4,16,128], index: 0, kind: input, shape index: {}]   ;;  %s821_s1 = inlined_call_operand.hbm [shape: f32[4,16,128], index: 1, kind: input, shape index: {}]   ;;  %s822_s2 = inlined_call_operand.hbm [shape: f32[16,128], index: 2, kind: output, shape index: {}]  }
   0x1   :  { %823 = sst [smem:[#allocation11_spill]] %s820_s0 }
   0x2   :  { %7 = vsyncpa [#allocation3], 0 }
   0x3   :  { %9 = vsyncpa [#allocation3 + $0x1], 0 }
   0x4   :  { %10 = vsyncpa [#allocation6], 0 }
   0x5   :  { %12 = vsyncpa [#allocation6 + $0x1], 0 }
   0x6   :  { %13 = vsyncpa [#allocation4], 0 }
   0x7   :  { %15 = vsyncpa [#allocation4 + $0x1], 0  ;;  %s646_s9 = smov 0   ;;  %s648_s10 = smov 0  }
   0x8   :  { %s650_s11 = smov 0   ;;  %s652_s12 = smov 0  }
   0x9   :  { %s654_s13 = smov 0   ;;  %s656_s14 = smov 0  }
   0xa LB: > { %s381_s15 = sadd.s32 4294967295, %s623_s14   ;;  %s382_s16 = sadd.s32 4294967294, %s623_s14   ;;  %s623_s14 = sphi %s656_s14, %s21_s14   ;;  %s619_s13 = sphi %s654_s13, %s836_s13   ;;  %s615_s12 = sphi %s652_s12, %s835_s12   ;;  %s611_s11 = sphi %s650_s11, %s834_s11   ;;  %s607_s10 = sphi %s648_s10, %s833_s10   ;;  %s603_s9 = sphi %s646_s9, %s832_s9  }
   0xb   : > { %s33_s17 = sadd.s32 1, %s619_s13  ;;  %s42_s18 = sadd.s32 1, %s611_s11 }
   0xc   : > { %p35_p0 = scmp.ge.s32.totalorder %s33_s17, 2  ;;  %p49_p1 = scmp.ne.s32.totalorder %s611_s11, %s607_s10 }
   0xd   : > { %p50_p2 = scmp.eq.s32.totalorder %s623_s14, 0  ;;  %p55_p3 = scmp.ne.s32.totalorder %s607_s10, %s603_s9 }
   0xe   : > { %s838_s17 = smov (%p35_p0, %s33_s17), 0  ;;  %p56_p5 = scmp.eq.s32.totalorder %s381_s15, 0 }
   0xf   : > { %p687_p4 = por %p50_p2, %p49_p1  ;;  %s37_s20 = ssub.s32 %s619_s13, %s838_s17 }
  0x10   : > { %p109_p6 = scmp.eq.s32.totalorder %s381_s15, 1  ;;  %p40_p7 = scmp.eq.s32.totalorder %s37_s20, 0 }
  0x11   : > { %p693_p8 = por %p56_p5, %p55_p3  ;;  %p115_p10 = scmp.eq.s32.totalorder %s382_s16, 1 }
  0x12   : > { %p697_p9 = por %p109_p6, %p49_p1  ;;  %p420_p13 = scmp.lt.s32.totalorder %s623_s14, 2 }
  0x13   : > { %s702_s23 = scalar_select %p40_p7, %s611_s11, %s42_s18  }
  0x14   : > { %p704_p11 = por %p115_p10, %p55_p3  ;;  %s711_s25 = sand.u32 1, %s611_s11  }
  0x15   : > { %s385_s26 = sshll.u32 %s711_s25, 5  ;;  %s386_s27 = sshll.u32 %s619_s13, 7 }
  0x16   : > { %s828_s0 = sld [smem:[#allocation11_spill]]  ;;  %s139_s3 = scalar_lea.vmem [#allocation2], %s385_s26 }
  0x17   : > { %s146_s4 = sshll.u32 %s139_s3, 4  ;;  %p724_p0 = pnand %p420_p13, %p687_p4  ;;  %s147_s4 = int_to_ptr.vmem [resolvable:$true] %s146_s4 }
  0x18   : > { %s136_s6 = scalar_lea.sflag [#allocation3], %s711_s25  ;;  %s496_s7 = scalar_lea.vmem %s147_s4, 512 }
  0x19   : > { %p485_p1 = pneg %p724_p0  ;;  %p497_p2 = scmp.ne.s32.totalorder %s147_s4, %s496_s7 }
  0x1a   : > { %s625_s8 = smov [#allocation2]  }
  0x1b   : > { %p499_p3 = pnand %p497_p2, %p485_p1  ;;  %s501_s15 = sshll.u32 %s625_s8, 4  ;;  %s502_s15 = int_to_ptr.vmem [resolvable:$false] %s501_s15 }
  0x1c   : > { %s145_s30 = scalar_lea.hbm %s828_s0, %s386_s27  ;;  %s503_s16 = scalar_lea.vmem %s502_s15, 1024 }
  0x1d   : > { %p500_p5 = pneg %p499_p3  ;;  %p504_p6 = scmp.lt.s32.totalorder %s147_s4, %s502_s15 }
  0x1e   : > { %p505_p4 = scmp.lt.s32.totalorder %s503_s16, %s496_s7 }
  0x20   : > { %p506_p7 = por %p505_p4, %p504_p6 }
  0x22   : > { %p507_p10 = pnand %p506_p7, %p500_p5 }
  0x24   : > { %510 = shalt.err (!%p507_p10)
}
  0x25   : > { %s626_s18 = smov 256   ;;  %s627_s19 = smov 128  }
  0x26   : > { %s628_s20 = smov 8   ;;  %p389_p13 = scmp.ge.s32.totalorder %s623_s14, 1 }
  0x27   : > { %412 = dma.hbm_to_vmem [thread:$0]  (!%p724_p0), %s145_s30, 512, %s147_s4, %s136_s6, %s626_s18, %s627_s19, %s628_s20  }
  0x28   : > { %p175_p2 = scmp.lt.s32.totalorder %s623_s14, 3  ;;  %s166_s7 = scalar_lea.hbm %s821_s1, %s386_s27 }
  0x29   : > { %s160_s8 = scalar_lea.vmem [#allocation5], %s385_s26  ;;  %s157_s16 = scalar_lea.sflag [#allocation6], %s711_s25 }
  0x2a   : > { %p739_p3 = pnand %p389_p13, %p175_p2  ;;  %s167_s15 = sshll.u32 %s160_s8, 4  ;;  %s168_s15 = int_to_ptr.vmem [resolvable:$true] %s167_s15 }
  0x2b   : > { %s524_s0 = scalar_lea.vmem %s168_s15, 512  ;;  %s629_s30 = smov [#allocation5]  }
  0x2c   : > { %p525_p5 = scmp.ne.s32.totalorder %s168_s15, %s524_s0  ;;  %s529_s4 = sshll.u32 %s629_s30, 4  ;;  %s530_s4 = int_to_ptr.vmem [resolvable:$false] %s529_s4 }
  0x2d   : > { %s531_s6 = scalar_lea.vmem %s530_s4, 1024  ;;  %p532_p7 = scmp.lt.s32.totalorder %s168_s15, %s530_s4 }
  0x2e   : > { %p527_p6 = pnand %p525_p5, %p485_p1  ;;  %p533_p10 = scmp.lt.s32.totalorder %s531_s6, %s524_s0 }
  0x30   : > { %p528_p4 = pneg %p527_p6  ;;  %p534_p13 = por %p533_p10, %p532_p7 }
  0x32   : > { %p535_p2 = pnand %p534_p13, %p528_p4 }
  0x34   : > { %538 = shalt.err (!%p535_p2)
}
  0x35   : > { %415 = dma.hbm_to_vmem [thread:$0]  (!%p724_p0), %s166_s7, 512, %s168_s15, %s157_s16, %s626_s18, %s627_s19, %s628_s20  }
  0x36   : > { %179 = sbr.rel (%p739_p3) target bundleno = 123 (0x7b), region = 28  ;;  %s760_s25 = sand.u32 (!%p739_p3), 1, %s607_s10  }
  0x37   : > { %s390_s26 = sshll.u32 (!%p739_p3), %s760_s25, 5  ;;  %s182_s27 = scalar_lea.sflag (!%p739_p3), [#allocation3], %s760_s25 }
  0x38   : > { %s764_s29 = scalar_lea.vmem (!%p739_p3), [#allocation2], %s390_s26 }
  0x3b   : > { %590 = dma.done.wait (%p693_p8), %s182_s27, 512  }
  0x3c   : > { %592 = vsyncadd (%p693_p8), %s182_s27, 4294966784  ;;  %s191_s0 = scalar_lea.sflag [#allocation6], %s760_s25  ;;  %s194_s5 = scalar_lea.vmem [#allocation5], %s390_s26 }
  0x3d   : > { %594 = dma.done.wait (%p693_p8), %s191_s0, 512  }
  0x3e   : > { %596 = vsyncadd (%p693_p8), %s191_s0, 4294966784  ;;  %v220_v0 = vld [vmem:[%s194_s5] sm:$0xff]  ;;  %v393_v1 = vld [vmem:[%s194_s5 + $0x8] sm:$0xff]  ;;  %s392_s21 = sshll.u32 %s760_s25, 3  ;;  %s400_s20 = sshll.u32 %s615_s12, 7 }
  0x3f   : > { %v394_v2 = vld [vmem:[%s194_s5 + $0x10] sm:$0xff]  ;;  %v223_v3 = vmax.f32 %v220_v0, %v393_v1  ;;  %v395_v4 = vld [vmem:[%s194_s5 + $0x18] sm:$0xff]  ;;  %v233_v20 = vld [vmem:[%s764_s29] sm:$0xff]  ;;  %s219_s18 = scalar_lea.vmem [#allocation7], %s392_s21  ;;  %s275_s7 = scalar_lea.hbm %s822_s2, %s400_s20 }
  0x40   : > { %v396_v21 = vld [vmem:[%s764_s29 + $0x8] sm:$0xff]  ;;  %v397_v26 = vld [vmem:[%s764_s29 + $0x10] sm:$0xff]  ;;  %v398_v29 = vld [vmem:[%s764_s29 + $0x18] sm:$0xff]  ;;  %s277_s19 = sshll.u32 %s219_s18, 4  ;;  %s263_s8 = scalar_lea.sflag [#allocation4], %s760_s25  ;;  %s278_s19 = int_to_ptr.vmem [resolvable:$true] %s277_s19 }
  0x41   : > { %v226_v5 = vmax.f32 %v223_v3, %v394_v2  ;;  %s539_s15 = scalar_lea.vmem %s278_s19, 128  ;;  %s630_s16 = smov [#allocation7]  }
  0x42   : > { %p540_p8 = scmp.ne.s32.totalorder %s278_s19, %s539_s15  ;;  %s543_s30 = sshll.u32 %s630_s16, 4  ;;  %s544_s30 = int_to_ptr.vmem [resolvable:$false] %s543_s30 }
  0x43   : > { %v229_v6 = vmax.f32 %v226_v5, %v395_v4  ;;  %s545_s4 = scalar_lea.vmem %s544_s30, 256  ;;  %p546_p3 = scmp.lt.s32.totalorder %s278_s19, %s544_s30 }
  0x44   : > { %p541_p0 = pnand %p540_p8, %p697_p9  ;;  %p547_p5 = scmp.lt.s32.totalorder %s545_s4, %s539_s15 }
  0x45   : > { %v230_v7 = vsub.f32 %v220_v0, %v229_v6  ;;  %v235_v8 = vsub.f32 %v393_v1, %v229_v6  ;;  %v243_v9 = vsub.f32 %v394_v2, %v229_v6  ;;  %v251_v10 = vsub.f32 %v395_v4, %v229_v6 }
  0x46   : > { %p542_p1 = pneg %p541_p0  ;;  %p548_p6 = por %p547_p5, %p546_p3 }
  0x47   : > { %v231_v11 = vmul.f32 1.442695, %v230_v7  ;;  %v236_v12 = vmul.f32 1.442695, %v235_v8  ;;  %v244_v13 = vmul.f32 1.442695, %v243_v9 }
  0x48   : > { %v252_v14 = vmul.f32 1.442695, %v251_v10  ;;  %p549_p4 = pnand %p548_p6, %p542_p1 }
  0x49   : > { %473 = vpow2.f32 %v231_v11 }
  0x4a   : > { %475 = vpow2.f32 %v236_v12 }
  0x4b   : > { %477 = vpow2.f32 %v244_v13 }
  0x4c   : > { %479 = vpow2.f32 %v252_v14 }
  0x56   : > { %v474_v15 = vpop.eup %473 }
  0x57   : > { %v476_v16 = vpop.eup %475  ;;  %v234_v23 = vmul.f32 %v474_v15, %v233_v20 }
  0x58   : > { %v478_v17 = vpop.eup %477  ;;  %v242_v18 = vadd.f32 %v476_v16, %v474_v15  ;;  %v240_v24 = vmul.f32 %v476_v16, %v396_v21 }
  0x59   : > { %v480_v19 = vpop.eup %479  ;;  %v248_v28 = vmul.f32 %v478_v17, %v397_v26 }
  0x5a   : > { %v250_v22 = vadd.f32 %v478_v17, %v242_v18  ;;  %v241_v27 = vadd.f32 %v240_v24, %v234_v23  ;;  %v256_v31 = vmul.f32 %v480_v19, %v398_v29 }
  0x5c   : > { %v258_v25 = vadd.f32 %v480_v19, %v250_v22  ;;  %v249_v30 = vadd.f32 %v248_v28, %v241_v27 }
  0x5e   : > { %481 = vrcp.f32 %v258_v25  ;;  %v257_v32 = vadd.f32 %v256_v31, %v249_v30 }
  0x6b   : > { %v482_v33 = vpop.eup %481 }
  0x6c   : > { %v260_v34 = vmul.f32 %v482_v33, %v257_v32 }
  0x6e   : > { %261 = vst [vmem:[%s219_s18] sm:$0xff] %v260_v34 }
  0x6f   : > { %552 = shalt.err (!%p549_p4)
}
  0x70   : > { %s553_s12 = scalar_lea.hbm %s275_s7, 128  ;;  %s557_s26 = scalar_lea.hbm %s822_s2, 256 }
  0x71   : > { %p554_p7 = scmp.ne.s32.totalorder %s275_s7, %s553_s12  ;;  %p558_p2 = scmp.lt.s32.totalorder %s275_s7, %s822_s2 }
  0x72   : > { %p559_p8 = scmp.lt.s32.totalorder %s557_s26, %s553_s12 }
  0x73   : > { %p555_p10 = pnand %p554_p7, %p697_p9 }
  0x74   : > { %p560_p0 = por %p559_p8, %p558_p2 }
  0x75   : > { %p556_p13 = pneg %p555_p10 }
  0x77   : > { %p561_p12 = pnand %p560_p0, %p556_p13 }
  0x79   : > { %564 = shalt.err (!%p561_p12)
}
  0x7a   : > { %407 = dma.vmem_to_hbm [thread:$0]  (%p697_p9), %s278_s19, 128, %s275_s7, %s263_s8  }
  0x7b PF: > { %s289_s0 = sand.u32 1, %s603_s9   ;;  %p831_p1 = scmp.ge.s32.totalorder %s623_s14, 2 }
  0x7c   : > { %s290_s5 = scalar_lea.sflag [#allocation4], %s289_s0 }
  0x7d   : > { %p417_p3 = pnand %p831_p1, %p704_p11 }
  0x7f   : > { %p418_p5 = pneg %p417_p3 }
  0x81   : > { %598 = dma.done.wait (%p418_p5), %s290_s5, 128  }
  0x82   : > { %600 = vsyncadd (%p418_p5), %s290_s5, 4294967168  ;;  %s21_s14 = sadd.s32 1, %s623_s14   ;;  %s832_s9 = smov %s607_s10 }
  0x83   : > { %p18_p6 = scmp.ge.s32.totalorder %s21_s14, 4   ;;  %s833_s10 = smov %s611_s11 }
  0x84   : > { %s834_s11 = smov %s702_s23  ;;  %s835_s12 = smov %s619_s13 }
  0x85   : > { %s836_s13 = smov %s838_s17  ;;  %20 = sbr.rel (!%p18_p6) target bundleno = 10 (0xa), region = 92 }
  0x8a   :  { %295 = vsyncpa [#allocation3], 1 }
  0x8b   :  { %297 = vsyncpa [#allocation3 + $0x1], 1 }
  0x8c   :  { %298 = vsyncpa [#allocation6], 1 }
  0x8d   :  { %300 = vsyncpa [#allocation6 + $0x1], 1 }
  0x8e   :  { %301 = vsyncpa [#allocation4], 1 }
  0x8f   :  { %303 = vsyncpa [#allocation4 + $0x1], 1 }

</bundles_post_ra>
